<compile_context>
chip_gen: v7x
topology: tpu7x:2x2x1
jax: 0.10.0
libtpu: 0.0.40
codegen_flags: <defaults>
</compile_context>

<pallas_src>
import jax
import jax.numpy as jnp
from jax import lax
from jax.experimental import pallas as pl
from jax.experimental.pallas import tpu as pltpu


def _round_up(x, m):
    return ((x + m - 1) // m) * m


def _pick_tb(batch, s8, target_rows=512):
    """Batches per grid tile.

    M = tb * s8 rows feed the MXU per step; target ~512 rows (4x128 for v5e,
    2x256 for v6e/v7x).  tb must divide batch and be a multiple of 8 (or the
    whole batch) so the (tb, Sp) output block is (8,128)-legal.  Tiles this
    size are far below the v7x 64 MiB VMEM budget even double-buffered.
    """
    valid = [tb for tb in range(1, batch + 1)
             if batch % tb == 0 and (tb % 8 == 0 or tb == batch)]
    fitting = [tb for tb in valid if tb * s8 <= target_rows]
    return max(fitting) if fitting else min(valid)


def attention_forward(hidden, encoder_outputs, attn_w, attn_b, v):
    """hidden: [B, Dd]; encoder_outputs: [S, B, De]; attn_w: [Dd, Dd+De];
    attn_b: [Dd]; v: [Dd].  Returns softmax attention weights [B, S]."""
    B, Dd = hidden.shape
    S, Bi, De = encoder_outputs.shape
    assert Bi == B

    # PyTorch concat order is (hidden, encoder_outputs): split the fused Linear
    # weight accordingly and transpose to (in x out) for right-multiplication.
    wh_t = attn_w[:, :Dd].T.astype(jnp.float32)          # (Dd, Dd)
    we_t = attn_w[:, Dd:].T.astype(jnp.float32)          # (De, Dd)

    # Feedback #2: hoist the hidden projection (+ bias) — one (B,Dd)@(Dd,Dd)
    # matmul for the whole batch, done in wrapper XLA.
    proj_h = (hidden.astype(jnp.float32) @ wh_t + attn_b.astype(jnp.float32)[None, :])
    ph3 = proj_h.reshape(B, 1, Dd)                       # (B, 1, Dd) for broadcast add

    # Batch-major encoder rows feed the MXU M dimension (feedback #1).
    enc3 = jnp.transpose(encoder_outputs, (1, 0, 2)).astype(jnp.float32)   # (B, S, De)

    # Pad src_len to a sublane multiple so the in-kernel (TB,S,De)->(TB*S,De)
    # merge is a pure layout no-op; padded positions are masked to -inf.
    S8 = _round_up(S, 8)
    if S8 != S:
        enc3 = jnp.concatenate(
            [enc3, jnp.zeros((B, S8 - S, De), enc3.dtype)], axis=1)

    Sp = _round_up(S8, 128)          # lane-dense output width (feedback #4)
    TB = _pick_tb(B, S8)             # batches per tile -> M = TB*S8 matmul rows
    grid = (B // TB,)

    v3 = v.reshape(1, 1, Dd).astype(jnp.float32)

    def kernel(e_ref, ph_ref, we_ref, v_ref, o_ref):
        # e_ref : (TB, S8, De)   encoder rows for TB batches
        # ph_ref: (TB, 1, Dd)    precomputed hidden projection + bias
        # we_ref: (De, Dd)       encoder-side weight slice (in x out)
        # v_ref : (1, 1, Dd)     scoring vector
        # o_ref : (TB, Sp)       lane-dense softmax output slab
        e2 = e_ref[...].reshape(TB * S8, De)
        # Feedback #1: one big-M MXU matmul per grid step.
        proj = jnp.dot(e2, we_ref[...], preferred_element_type=jnp.float32)   # (TB*S8, Dd)
        energy = jnp.tanh(proj.reshape(TB, S8, Dd) + ph_ref[...])             # (TB, S8, Dd)

        # Feedback #3: v-score as VPU multiply + lane (minor-axis) reduce.
        score = jnp.sum(energy * v_ref[...], axis=-1)                         # (TB, S8)
        if S8 != S:
            col = lax.broadcasted_iota(jnp.int32, (TB, S8), 1)
            score = jnp.where(col < S, score, -jnp.inf)

        # Softmax over src_len (lane axis); feedback #10: EUP approx reciprocal.
        score = score - jnp.max(score, axis=-1, keepdims=True)
        p = jnp.exp(score)
        attn = p * pl.reciprocal(jnp.sum(p, axis=-1, keepdims=True), approx=True)

        if Sp != S8:                 # pad lanes so the store is a full, unmasked vst
            attn = jnp.concatenate(
                [attn, jnp.zeros((TB, Sp - S8), attn.dtype)], axis=-1)
        o_ref[...] = attn

    out = pl.pallas_call(
        kernel,
        out_shape=jax.ShapeDtypeStruct((B, Sp), jnp.float32),
        grid_spec=pltpu.PrefetchScalarGridSpec(
            num_scalar_prefetch=0,
            grid=grid,
            in_specs=[
                pl.BlockSpec((TB, S8, De), lambda i: (i, 0, 0)),   # encoder tile
                pl.BlockSpec((TB, 1, Dd), lambda i: (i, 0, 0)),    # proj_h tile
                pl.BlockSpec((De, Dd), lambda i: (0, 0)),          # We (constant)
                pl.BlockSpec((1, 1, Dd), lambda i: (0, 0, 0)),     # v  (constant)
            ],
            out_specs=pl.BlockSpec((TB, Sp), lambda i: (i, 0)),
        ),
        # Feedback #8: parallel batch-tile axis -> megacore / v7x 2-TC sharding.
        compiler_params=pltpu.CompilerParams(dimension_semantics=("parallel",)),
    )(enc3, ph3, we_t, v3)

    return out[:, :S]


def attention_reference(hidden, encoder_outputs, attn_w, attn_b, v):
    """Pure-JAX reference mirroring the PyTorch forward."""
    S, B, De = encoder_outputs.shape
    h_rep = jnp.repeat(hidden[:, None, :], S, axis=1)                       # (B, S, Dd)
    enc = jnp.transpose(encoder_outputs, (1, 0, 2))                         # (B, S, De)
    cat = jnp.concatenate([h_rep, enc], axis=2)                             # (B, S, Dd+De)
    energy = jnp.tanh(jnp.einsum("bsi,oi->bso", cat, attn_w) + attn_b)      # (B, S, Dd)
    attention = jnp.einsum("bso,o->bs", energy, v)                          # (B, S)
    return jax.nn.softmax(attention, axis=1)


if __name__ == "__main__":
    enc_hid_dim = 16
    dec_hid_dim = 32
    B, S = 2, 8
    De = enc_hid_dim * 2
    Dd = dec_hid_dim

    key = jax.random.PRNGKey(0)
    k1, k2, k3, k4, k5 = jax.random.split(key, 5)

    hidden = jax.random.normal(k1, (B, Dd), dtype=jnp.float32)
    encoder_outputs = jax.random.normal(k2, (S, B, De), dtype=jnp.float32)

    # Parameter shapes from nn.Linear(De + Dd, Dd) and nn.Parameter(rand(Dd)).
    bound = 1.0 / jnp.sqrt(De + Dd)
    attn_w = jax.random.uniform(k3, (Dd, De + Dd), minval=-bound, maxval=bound, dtype=jnp.float32)
    attn_b = jax.random.uniform(k4, (Dd,), minval=-bound, maxval=bound, dtype=jnp.float32)
    v = jax.random.uniform(k5, (Dd,), minval=0.0, maxval=1.0, dtype=jnp.float32)

    out = attention_forward(hidden, encoder_outputs, attn_w, attn_b, v)
    out = jax.block_until_ready(out)

    ref = attention_reference(hidden, encoder_outputs, attn_w, attn_b, v)
    assert out.shape == (B, S)
    # Tolerance relaxed from 1e-5 to 5e-3 because the softmax denominator uses the
    # EUP approximate reciprocal (per review correctness note); structure is exact.
    assert jnp.allclose(out, ref, atol=5e-3, rtol=5e-3), (out, ref)
    assert jnp.allclose(jnp.sum(out, axis=1), 1.0, atol=5e-3)

    print("KERNEL_OK")
</pallas_src>

<mosaic_0001>
module attributes {stable_mosaic.version = 11 : i64} {
  func.func @kernel(%arg0: i32, %arg1: memref<2x8x32xf32, #tpu.memory_space<vmem>>, %arg2: memref<2x1x32xf32, #tpu.memory_space<vmem>>, %arg3: memref<32x32xf32, #tpu.memory_space<vmem>>, %arg4: memref<1x1x32xf32, #tpu.memory_space<vmem>>, %arg5: memref<2x128xf32, #tpu.memory_space<vmem>>) attributes {dimension_semantics = [#tpu.dimension_semantics<parallel>], iteration_bounds = array<i64: 1>, scalar_prefetch = 0 : i64, scratch_operands = 0 : i64, tpu.core_type = #tpu.core_type<tc>, window_params = [{transform_indices = @transform_0, window_bounds = array<i64: 2, 8, 32>}, {transform_indices = @transform_1, window_bounds = array<i64: 2, 1, 32>}, {pipeline_mode = #tpu.pipeline_mode<synchronous>, transform_indices = @transform_2, window_bounds = array<i64: 32, 32>}, {pipeline_mode = #tpu.pipeline_mode<synchronous>, transform_indices = @transform_3, window_bounds = array<i64: 1, 1, 32>}, {transform_indices = @transform_4, window_bounds = array<i64: 2, 128>}]} {
    %c0 = arith.constant 0 : index
    %c0_0 = arith.constant 0 : index
    %c0_1 = arith.constant 0 : index
    %0 = vector.load %arg1[%c0, %c0_0, %c0_1] : memref<2x8x32xf32, #tpu.memory_space<vmem>>, vector<2x8x32xf32>
    %1 = vector.shape_cast %0 : vector<2x8x32xf32> to vector<16x32xf32>
    %c0_2 = arith.constant 0 : index
    %c0_3 = arith.constant 0 : index
    %2 = vector.load %arg3[%c0_2, %c0_3] : memref<32x32xf32, #tpu.memory_space<vmem>>, vector<32x32xf32>
    %cst = arith.constant dense<0.000000e+00> : vector<16x32xf32>
    %3 = tpu.matmul %1, %2, %cst {dimension_numbers = #tpu.dot_dimension_numbers<[1], [0], [0], [1], [0, 0, 1, 1], [], []>} : vector<16x32xf32>, vector<32x32xf32>, vector<16x32xf32> -> vector<16x32xf32>
    %4 = vector.shape_cast %3 : vector<16x32xf32> to vector<2x8x32xf32>
    %c0_4 = arith.constant 0 : index
    %c0_5 = arith.constant 0 : index
    %c0_6 = arith.constant 0 : index
    %5 = vector.load %arg2[%c0_4, %c0_5, %c0_6] : memref<2x1x32xf32, #tpu.memory_space<vmem>>, vector<2x1x32xf32>
    %6 = vector.broadcast %5 : vector<2x1x32xf32> to vector<2x8x32xf32>
    %7 = arith.addf %4, %6 : vector<2x8x32xf32>
    %8 = math.tanh %7 : vector<2x8x32xf32>
    %c0_7 = arith.constant 0 : index
    %c0_8 = arith.constant 0 : index
    %c0_9 = arith.constant 0 : index
    %9 = vector.load %arg4[%c0_7, %c0_8, %c0_9] : memref<1x1x32xf32, #tpu.memory_space<vmem>>, vector<1x1x32xf32>
    %10 = vector.broadcast %9 : vector<1x1x32xf32> to vector<2x8x32xf32>
    %11 = arith.mulf %8, %10 : vector<2x8x32xf32>
    %cst_10 = arith.constant dense<0.000000e+00> : vector<2x8xf32>
    %12 = vector.multi_reduction <add>, %11, %cst_10 [2] : vector<2x8x32xf32> to vector<2x8xf32>
    %cst_11 = arith.constant dense<0xFF800000> : vector<2xf32>
    %13 = vector.multi_reduction <maximumf>, %12, %cst_11 [1] : vector<2x8xf32> to vector<2xf32>
    %14 = vector.shape_cast %13 : vector<2xf32> to vector<2x1xf32>
    %15 = vector.broadcast %14 : vector<2x1xf32> to vector<2x8xf32>
    %16 = arith.subf %12, %15 : vector<2x8xf32>
    %17 = math.exp %16 : vector<2x8xf32>
    %cst_12 = arith.constant dense<0.000000e+00> : vector<2xf32>
    %18 = vector.multi_reduction <add>, %17, %cst_12 [1] : vector<2x8xf32> to vector<2xf32>
    %19 = vector.shape_cast %18 : vector<2xf32> to vector<2x1xf32>
    %20 = tpu.reciprocal %19 {approx = true} : vector<2x1xf32> -> vector<2x1xf32>
    %21 = vector.broadcast %20 : vector<2x1xf32> to vector<2x8xf32>
    %22 = arith.mulf %17, %21 : vector<2x8xf32>
    %cst_13 = arith.constant 0.000000e+00 : f32
    %23 = vector.broadcast %cst_13 : f32 to vector<2x120xf32>
    %24 = tpu.concatenate %22, %23 in 1 : vector<2x8xf32>, vector<2x120xf32> -> vector<2x128xf32>
    %c0_14 = arith.constant 0 : index
    %c0_15 = arith.constant 0 : index
    %25 = vector.load %arg5[%c0_14, %c0_15] : memref<2x128xf32, #tpu.memory_space<vmem>>, vector<2x128xf32>
    tpu.vector_store %arg5[%c0_14, %c0_15], %24 {strides = array<i32>} : memref<2x128xf32, #tpu.memory_space<vmem>>, vector<2x128xf32>,
    return
  }
  func.func @transform_0(%arg0: i32) -> (i32, i32, i32) {
    %c0_i32 = arith.constant 0 : i32
    %c0_i32_0 = arith.constant 0 : i32
    %c0_i32_1 = arith.constant 0 : i32
    return %arg0, %c0_i32, %c0_i32_0 : i32, i32, i32
  }
  func.func @transform_1(%arg0: i32) -> (i32, i32, i32) {
    %c0_i32 = arith.constant 0 : i32
    %c0_i32_0 = arith.constant 0 : i32
    %c0_i32_1 = arith.constant 0 : i32
    return %arg0, %c0_i32, %c0_i32_0 : i32, i32, i32
  }
  func.func @transform_2(%arg0: i32) -> (i32, i32) {
    %c0_i32 = arith.constant 0 : i32
    %c0_i32_0 = arith.constant 0 : i32
    %c0_i32_1 = arith.constant 0 : i32
    return %c0_i32, %c0_i32_0 : i32, i32
  }
  func.func @transform_3(%arg0: i32) -> (i32, i32, i32) {
    %c0_i32 = arith.constant 0 : i32
    %c0_i32_0 = arith.constant 0 : i32
    %c0_i32_1 = arith.constant 0 : i32
    %c0_i32_2 = arith.constant 0 : i32
    return %c0_i32, %c0_i32_0, %c0_i32_1 : i32, i32, i32
  }
  func.func @transform_4(%arg0: i32) -> (i32, i32) {
    %c0_i32 = arith.constant 0 : i32
    %c0_i32_0 = arith.constant 0 : i32
    return %arg0, %c0_i32 : i32, i32
  }
}

</mosaic_0001>

<bundles_post_ra>
// kernel: tpu_custom_call.1
= control target key start
LH: loop header
LB: loop body
LE: loop exit
PB: predicated region body
PF: predicated region fallthrough
CT: control target
= control target key end

     0   :  { %9 = vsyncpa [#allocation3], 0  ;;  %s480_s0 = inlined_call_operand.hbm [shape: f32[2,8,32], index: 0, kind: input, shape index: {}]   ;;  %s481_s1 = inlined_call_operand.vmem [shape: f32[2,1,32], index: 1, kind: input, shape index: {}]   ;;  %s482_s2 = inlined_call_operand.hbm [shape: f32[32,32], index: 2, kind: input, shape index: {}]   ;;  %s483_s3 = inlined_call_operand.vmem [shape: f32[1,1,32], index: 3, kind: input, shape index: {}]   ;;  %s484_s4 = inlined_call_operand.hbm [shape: f32[2,128], index: 4, kind: output, shape index: {}]  }
   0x1   :  { %10 = vsyncpa [#allocation6], 0 }
   0x2   :  { %11 = vsyncpa [#allocation4], 0  ;;  %s395_s15 = smov [#allocation2]   ;;  %s323_s19 = scalar_lea.hbm %s480_s0, 256 }
   0x3   :  { %s17_s16 = sshll.u32 %s395_s15, 4  ;;  %p324_p0 = scmp.ne.s32.totalorder %s480_s0, %s323_s19  ;;  %s18_s16 = int_to_ptr.vmem [resolvable:$true] %s17_s16 }
   0x4   :  { %p327_p1 = scmp.lt.u32.totalorder %s323_s19, %s480_s0 }
   0x6   :  { %p329_p2 = pnand %p327_p1, %p324_p0 }
   0x8   :  { %332 = shalt.err (!%p329_p2)
}
   0x9   :  { %s333_s24 = scalar_lea.vmem %s18_s16, 256  ;;  %p338_p4 = scmp.lt.s32.totalorder %s18_s16, %s18_s16 }
   0xa   :  { %p334_p3 = scmp.ne.s32.totalorder %s18_s16, %s333_s24  ;;  %p339_p5 = scmp.lt.s32.totalorder %s333_s24, %s333_s24 }
   0xc   :  { %p340_p6 = por %p339_p5, %p338_p4 }
   0xe   :  { %p341_p7 = pnand %p340_p6, %p334_p3 }
  0x10   :  { %344 = shalt.err (!%p341_p7)
}
  0x11   :  { %s396_s25 = smov 128   ;;  %s397_s26 = smov 8  }
  0x12   :  { %23 = dma.hbm_to_vmem [thread:$0]  %s480_s0, 256, %s18_s16, [#allocation3], %s396_s25, %s396_s25, %s397_s26  }
  0x13   :  { %s398_s29 = smov [#allocation5]   ;;  %s345_s7 = scalar_lea.hbm %s482_s2, 512 }
  0x14   :  { %s31_s30 = sshll.u32 %s398_s29, 4  ;;  %p346_p8 = scmp.ne.s32.totalorder %s482_s2, %s345_s7  ;;  %s32_s30 = int_to_ptr.vmem [resolvable:$true] %s31_s30 }
  0x15   :  { %p349_p9 = scmp.lt.u32.totalorder %s345_s7, %s482_s2 }
  0x17   :  { %p351_p10 = pnand %p349_p9, %p346_p8 }
  0x19   :  { %354 = shalt.err (!%p351_p10)
}
  0x1a   :  { %s355_s12 = scalar_lea.vmem %s32_s30, 512  ;;  %p360_p12 = scmp.lt.s32.totalorder %s32_s30, %s32_s30 }
  0x1b   :  { %p356_p11 = scmp.ne.s32.totalorder %s32_s30, %s355_s12  ;;  %p361_p13 = scmp.lt.s32.totalorder %s355_s12, %s355_s12 }
  0x1d   :  { %p362_p0 = por %p361_p13, %p360_p12 }
  0x1f   :  { %p363_p1 = pnand %p362_p0, %p356_p11 }
  0x21   :  { %366 = shalt.err (!%p363_p1)
}
  0x22   :  { %37 = dma.hbm_to_vmem [thread:$0]  %s482_s2, 512, %s32_s30, [#allocation6], %s396_s25, %s396_s25, %s397_s26  }
  0x23   :  { %389 = dma.done.wait [#allocation3], 256  }
  0x24   :  { %390 = vsyncadd [#allocation3], 4294967040 }
  0x25   :  { %391 = dma.done.wait [#allocation6], 512  }
  0x26   :  { %392 = vsyncadd [#allocation6], 4294966784  ;;  %vm52_vm0 = vcmask 261120   ;;  %v48_v0 = vld [vmem:[#allocation5] sm:$0xff]  ;;  %v49_v1 = vld [vmem:[#allocation5 + $0x8] sm:$0xff]  ;;  %v169_v21 = vlaneseq  ;;  %vm179_vm1 = vcmask 1041409  }
  0x27   :  { %v50_v2 = vld [vmem:[#allocation5 + $0x10] sm:$0xff]  ;;  %v297_v3 = vpack.c.bf16 %v49_v1, %v48_v0  ;;  %v51_v4 = vld [vmem:[#allocation5 + $0x18] sm:$0xff]  ;;  %vm182_vm2 = vcmask 58368   ;;  %v399_v31 = vmov 0   ;;  %vm256_vm3 = vcmask 64512  }
  0x28   :  { %v46_v5 = vld [vmem:[#allocation2] sm:$0xff]  ;;  %v301_v6 = vpack.c.bf16 %v51_v4, %v50_v2  ;;  %v47_v7 = vld [vmem:[#allocation2 + $0x8] sm:$0xff]  ;;  %v170_v22 = vand.u32 127, %v169_v21  ;;  %v172_v23 = vshrl.u32 %v169_v21, 7  ;;  %312 = vset.pattern.permute.xlu0 %v399_v31  ;;  %311 = vset.pattern.permute.xlu1 %v399_v31 }
  0x29   :  { %294 = vmatprep.mubr.msk.f32.mxu0 %vm52_vm0, %v46_v5  ;;  %298 = vmatprep.subr.bf16.mxu0 %v297_v3  ;;  %v278_v8 = vld [vmem:[%s481_s1 + $0x1] ss:$0 sm:$0xff]  ;;  %v277_v9 = vld [vmem:[%s481_s1] ss:$0 sm:$0xff]  ;;  %s400_s1 = smov [#allocation7]  }
  0x2a   :  { %300 = vmatpush3.bf16.msra.mxu0 %v297_v3  ;;  %v279_v14 = vld [vmem:[%s483_s3] ss:$0 sm:$0xff]  ;;  %v173_v25 = vsub.s32 %v170_v22, %v172_v23  ;;  %v189_v32 = vsub.s32 0, %v172_v23  ;;  %v193_v33 = vsub.s32 1, %v172_v23  ;;  %s265_s3 = sshll.u32 %s400_s1, 4  ;;  %s266_s3 = int_to_ptr.vmem [resolvable:$true] %s265_s3 }
  0x2b   :  { %302 = vmatprep.subr.bf16.mxu0 %v301_v6  ;;  %s367_s19 = scalar_lea.vmem %s266_s3, 32  ;;  %p372_p3 = scmp.lt.s32.totalorder %s266_s3, %s266_s3 }
  0x2c   :  { %p368_p2 = scmp.ne.s32.totalorder %s266_s3, %s367_s19  ;;  %p373_p4 = scmp.lt.s32.totalorder %s367_s19, %s367_s19 }
  0x2e   :  { %304 = vmatpush3.bf16.msra.mxu0 %v301_v6  ;;  %p374_p5 = por %p373_p4, %p372_p3 }
  0x30   :  { %p375_p6 = pnand %p374_p5, %p368_p2 }
  0x31   :  { %295 = vmatmul.mubr.msk.f32.vlgmr.msra.gmra.mrb[0].mxu0 %vm52_vm0, %v47_v7 }
 0x104   :  { %v296_v10 = vpop.f32.mrb[0].mxu0 }
 0x105   :  { %v149_v11 = vadd.f32 %v296_v10, %v278_v8  ;;  %v125_v12 = vpop.f32.mrb[1].mxu0 }
 0x106   :  { %v148_v13 = vadd.f32 %v277_v9, %v125_v12 }
 0x107   :  { %313 = vtanh.f32 %v149_v11 }
 0x108   :  { %315 = vtanh.f32 %v148_v13 }
 0x111   :  { %v314_v15 = vpop.eup %313 }
 0x112   :  { %v316_v16 = vpop.eup %315  ;;  %v160_v19 = vmul.f32 %v314_v15, %v279_v14 }
 0x113   :  { %v159_v17 = vmul.f32 %v316_v16, %v279_v14 }
 0x114   :  { %v164_v20 = vsel %vm52_vm0, %v160_v19, 0.0 }
 0x115   :  { %v161_v18 = vsel %vm52_vm0, %v159_v17, 0.0 }
 0x116   :  { %162 = vadd.xlane.f32.xlu0 %v161_v18 }
 0x11a   :  { %165 = vadd.xlane.f32.xlu0 %v164_v20 }
 0x1a3   :  { %v163_v24 = vpop.xlane.xlu0 %162 }
 0x1a4   :  { %v174_v27 = vrot.slane %v163_v24, %v173_v25 }
 0x1a7   :  { %v166_v26 = vpop.xlane.xlu0 %165 }
 0x1a8   :  { %v178_v28 = vrot.slane %v166_v26, %v173_v25 }
 0x1aa   :  { %v180_v29 = vsel %vm179_vm1, %v178_v28, %v174_v27 }
 0x1ab   :  { %v183_v30 = vsel %vm182_vm2, %v180_v29, -inf }
 0x1ac   :  { %184 = vmax.xlane.f32.xlu1 %v183_v30 }
 0x239   :  { %v185_v34 = vpop.xlane.xlu1 %184 }
 0x23a   :  { %v190_v35 = vrot.slane %v185_v34, %v189_v32  ;;  %v194_v36 = vrot.slane %v185_v34, %v193_v33 }
 0x23c   :  { %v197_v37 = vsub.f32 %v163_v24, %v190_v35  ;;  %v198_v38 = vsub.f32 %v166_v26, %v194_v36 }
 0x23e   :  { %v199_v39 = vmul.f32 1.442695, %v197_v37  ;;  %v201_v40 = vmul.f32 1.442695, %v198_v38 }
 0x240   :  { %317 = vpow2.f32 %v199_v39 }
 0x241   :  { %319 = vpow2.f32 %v201_v40 }
 0x24a   :  { %v318_v41 = vpop.eup %317 }
 0x24b   :  { %v320_v42 = vpop.eup %319  ;;  %206 = vperm.xlu1 %311, %v318_v41  }
 0x24c   :  { %209 = vperm.xlu0 %312, %v320_v42  }
 0x2ca   :  { %v207_v43 = vpop.permute.xlu1 %206 }
 0x2cb   :  { %v210_v44 = vpop.permute.xlu0 %209  ;;  %v214_v45 = vrot.slane %v207_v43, %v173_v25 }
 0x2cc   :  { %v218_v46 = vrot.slane %v210_v44, %v173_v25 }
 0x2ce   :  { %v219_v47 = vsel %vm179_vm1, %v218_v46, %v214_v45 }
 0x2cf   :  { %v221_v48 = vsel %vm182_vm2, %v219_v47, 0.0 }
 0x2d0   :  { %222 = vadd.xlane.f32.xlu1 %v221_v48 }
 0x35d   :  { %v223_v49 = vpop.xlane.xlu1 %222 }
 0x35e   :  { %321 = vrcp.f32 %v223_v49 }
 0x368   :  { %v322_v50 = vpop.eup %321 }
 0x369   :  { %v229_v51 = vrot.slane %v322_v50, %v189_v32  ;;  %v233_v53 = vrot.slane %v322_v50, %v193_v33 }
 0x36b   :  { %v236_v52 = vmul.f32 %v318_v41, %v229_v51  ;;  %v237_v54 = vmul.f32 %v320_v42, %v233_v53 }
 0x36d   :  { %241 = vperm.xlu0 %312, %v236_v52  }
 0x371   :  { %244 = vperm.xlu0 %312, %v237_v54  }
 0x3ec   :  { %v242_v55 = vpop.permute.xlu0 %241 }
 0x3ed   :  { %v249_v57 = vrot.slane %v242_v55, %v173_v25 }
 0x3f0   :  { %v245_v56 = vpop.permute.xlu0 %244 }
 0x3f1   :  { %v253_v58 = vrot.slane %v245_v56, %v173_v25 }
 0x3f3   :  { %v254_v59 = vsel %vm179_vm1, %v253_v58, %v249_v57 }
 0x3f4   :  { %v257_v60 = vsel %vm256_vm3, %v254_v59, 0.0 }
 0x3f5   :  { %258 = vst [vmem:[#allocation7] sm:$0x3] %v257_v60 }
 0x3f6   :  { %378 = shalt.err (!%p375_p6)
}
 0x3f7   :  { %s379_s22 = scalar_lea.hbm %s484_s4, 32 }
 0x3f8   :  { %p380_p7 = scmp.ne.s32.totalorder %s484_s4, %s379_s22  ;;  %p383_p8 = scmp.lt.u32.totalorder %s379_s22, %s484_s4 }
 0x3fa   :  { %p385_p9 = pnand %p383_p8, %p380_p7 }
 0x3fc   :  { %388 = shalt.err (!%p385_p9)
}
 0x3fd   :  { %268 = dma.vmem_to_hbm [thread:$0]  %s266_s3, 32, %s484_s4, [#allocation4]  }
 0x3fe   :  { %393 = dma.done.wait [#allocation4], 32  }
 0x3ff   :  { %394 = vsyncadd [#allocation4], 4294967264 }
 0x400   :  { %272 = vsyncpa [#allocation3], 1 }
 0x401   :  { %273 = vsyncpa [#allocation6], 1 }
 0x402   :  { %274 = vsyncpa [#allocation4], 1 }

</bundles_post_ra>
